<compile_context>
chip_gen: v6e
topology: v6e:2x2x1
jax: 0.10.0
libtpu: 0.0.40
codegen_flags: <defaults>
</compile_context>

<pallas_src>
import functools

import jax
import jax.numpy as jnp
from jax.experimental import pallas as pl
from jax.experimental.pallas import tpu as pltpu


def _round_up(x, m):
    return (x + m - 1) // m * m


def _choose_tile_n(n, tile_n_max):
    """Pick a row-tile size (multiple of 8/16 rows)."""
    if n <= 256:
        # Small batches: single grid step, minimal padding waste.
        return _round_up(n, 8)
    # Medium/large batches: guarantee >= 2 grid steps so v7x's two TensorCores
    # both get work; cap at tile_n_max to bound VMEM / keep pipelining.
    half = _round_up(-(-n // 2), 16)
    return min(tile_n_max, half)


def _mlp_kernel(x_ref, w1_ref, b1_ref, w2_ref, b2_ref, o_ref, *,
                out_features, compute_dtype):
    # In-kernel cast of the f32 x block (VPU work hidden under the DMA).
    x = x_ref[...].astype(compute_dtype)
    # Layer 1 on the MXU: (tile_n, F) @ (F, H_pad), f32 accumulation.
    h = jnp.dot(x, w1_ref[...], preferred_element_type=jnp.float32)
    # Bias + ReLU epilogue in f32 on the VPU (v5e-safe: no bf16 elementwise).
    h = jnp.maximum(h + b1_ref[...], 0.0)
    # Layer 2 kept fully in f32: tiny matmul, kernel is memory-bound, so the
    # extra MXU passes are free and accuracy stays tight.
    out = jnp.dot(h, w2_ref[...], preferred_element_type=jnp.float32)
    out = out + b2_ref[...]
    # Only the true (narrow) output columns go back to HBM.
    o_ref[...] = out[:, :out_features].astype(o_ref.dtype)


def classifier_forward(x, w1, b1, w2, b2, *, tile_n_max=2048,
                       compute_dtype=jnp.bfloat16):
    """Pallas forward pass of Classifier.

    x:  (N, F) float32
    w1: (F, H) float32, b1: (1, H) float32
    w2: (H, O) float32, b2: (1, O) float32
    returns: (N, O) float32
    """
    N, F = x.shape
    H = w1.shape[1]
    O = w2.shape[1]

    # Lane-dense padding of hidden / output widths for the in-VMEM compute
    # (zero padding is exact: ReLU(0)=0 and zero weight rows/cols contribute 0).
    H_pad = _round_up(H, 128)
    O_pad = _round_up(O, 128)

    tile_n = _choose_tile_n(N, tile_n_max)
    grid_steps = -(-N // tile_n)

    # Weights / biases are tiny: pad (and cast W1) on the host once.
    w1_p = jnp.pad(w1, ((0, 0), (0, H_pad - H))).astype(compute_dtype)
    b1_p = jnp.pad(b1, ((0, 0), (0, H_pad - H))).astype(jnp.float32)
    w2_p = jnp.pad(w2, ((0, H_pad - H), (0, O_pad - O))).astype(jnp.float32)
    b2_p = jnp.pad(b2, ((0, 0), (0, O_pad - O))).astype(jnp.float32)

    cost = pl.CostEstimate(
        flops=2 * N * (F * H_pad + H_pad * O_pad),
        transcendentals=0,
        bytes_accessed=(N * F * 4                    # x read (f32, no pre-pass)
                        + N * O * 4                  # narrow output write
                        + F * H_pad * jnp.dtype(compute_dtype).itemsize
                        + H_pad * O_pad * 4          # weights (read once)
                        + H_pad * 4 + O_pad * 4))    # biases

    kernel = functools.partial(_mlp_kernel, out_features=O,
                               compute_dtype=compute_dtype)

    out = pl.pallas_call(
        kernel,
        out_shape=jax.ShapeDtypeStruct((N, O), jnp.float32),
        grid=(grid_steps,),
        in_specs=[
            pl.BlockSpec((tile_n, F), lambda i: (i, 0)),       # x: row-tiled
            pl.BlockSpec((F, H_pad), lambda i: (0, 0)),        # W1: resident
            pl.BlockSpec((1, H_pad), lambda i: (0, 0)),        # b1: resident
            pl.BlockSpec((H_pad, O_pad), lambda i: (0, 0)),    # W2: resident
            pl.BlockSpec((1, O_pad), lambda i: (0, 0)),        # b2: resident
        ],
        out_specs=pl.BlockSpec((tile_n, O), lambda i: (i, 0)), # narrow output
        compiler_params=pltpu.CompilerParams(
            dimension_semantics=("parallel",)),
        cost_estimate=cost,
    )(x, w1_p, b1_p, w2_p, b2_p)

    return out


def init_classifier_params(key, in_features, hidden=100, out_features=2):
    """Deterministic init (uniform, torch.nn.Linear-style bounds)."""
    k1, k2, k3, k4 = jax.random.split(key, 4)
    bound1 = 1.0 / jnp.sqrt(in_features)
    bound2 = 1.0 / jnp.sqrt(hidden)
    w1 = jax.random.uniform(k1, (in_features, hidden), jnp.float32, -bound1, bound1)
    b1 = jax.random.uniform(k2, (1, hidden), jnp.float32, -bound1, bound1)
    w2 = jax.random.uniform(k3, (hidden, out_features), jnp.float32, -bound2, bound2)
    b2 = jax.random.uniform(k4, (1, out_features), jnp.float32, -bound2, bound2)
    return w1, b1, w2, b2


def _reference(x, w1, b1, w2, b2):
    hi = jax.lax.Precision.HIGHEST
    h = jnp.maximum(jnp.dot(x, w1, precision=hi) + b1, 0.0)
    return jnp.dot(h, w2, precision=hi) + b2


if __name__ == "__main__":
    key = jax.random.PRNGKey(0)
    kx, kx2, kp = jax.random.split(key, 3)

    IN_FEATURES, HIDDEN, OUT_FEATURES = 32, 100, 2
    w1, b1, w2, b2 = init_classifier_params(kp, IN_FEATURES, HIDDEN, OUT_FEATURES)

    # Case 1: small batch, f32 compute path -> tight check, single grid step.
    N1 = 8
    x1 = jax.random.normal(kx, (N1, IN_FEATURES), jnp.float32)
    out1 = jax.block_until_ready(
        classifier_forward(x1, w1, b1, w2, b2, compute_dtype=jnp.float32))
    ref1 = _reference(x1, w1, b1, w2, b2)
    assert out1.shape == (N1, OUT_FEATURES)
    assert jnp.allclose(out1, ref1, atol=1e-3, rtol=1e-3)

    # Case 2: medium batch exercising the ragged multi-step grid (>= 2 steps for
    # v7x megacore) and the in-kernel bf16 cast of x.
    N2 = 300
    x2 = jax.random.normal(kx2, (N2, IN_FEATURES), jnp.float32)
    out2 = jax.block_until_ready(
        classifier_forward(x2, w1, b1, w2, b2, compute_dtype=jnp.bfloat16))
    ref2 = _reference(x2, w1, b1, w2, b2)
    assert out2.shape == (N2, OUT_FEATURES)
    assert jnp.allclose(out2, ref2, atol=2e-2, rtol=2e-2)

    print("KERNEL_OK")
</pallas_src>

<mosaic_0001>
module attributes {stable_mosaic.version = 11 : i64} {
  func.func @_mlp_kernel(%arg0: i32, %arg1: memref<8x32xf32, #tpu.memory_space<vmem>>, %arg2: memref<32x128xf32, #tpu.memory_space<vmem>>, %arg3: memref<1x128xf32, #tpu.memory_space<vmem>>, %arg4: memref<128x128xf32, #tpu.memory_space<vmem>>, %arg5: memref<1x128xf32, #tpu.memory_space<vmem>>, %arg6: memref<8x2xf32, #tpu.memory_space<vmem>>) attributes {dimension_semantics = [#tpu.dimension_semantics<parallel>], iteration_bounds = array<i64: 1>, scalar_prefetch = 0 : i64, scratch_operands = 0 : i64, tpu.core_type = #tpu.core_type<tc>, window_params = [{transform_indices = @transform_0, window_bounds = array<i64: 8, 32>}, {pipeline_mode = #tpu.pipeline_mode<synchronous>, transform_indices = @transform_1, window_bounds = array<i64: 32, 128>}, {pipeline_mode = #tpu.pipeline_mode<synchronous>, transform_indices = @transform_2, window_bounds = array<i64: 1, 128>}, {pipeline_mode = #tpu.pipeline_mode<synchronous>, transform_indices = @transform_3, window_bounds = array<i64: 128, 128>}, {pipeline_mode = #tpu.pipeline_mode<synchronous>, transform_indices = @transform_4, window_bounds = array<i64: 1, 128>}, {transform_indices = @transform_5, window_bounds = array<i64: 8, 2>}]} {
    %c0 = arith.constant 0 : index
    %c0_0 = arith.constant 0 : index
    %0 = vector.load %arg1[%c0, %c0_0] : memref<8x32xf32, #tpu.memory_space<vmem>>, vector<8x32xf32>
    %c0_1 = arith.constant 0 : index
    %c0_2 = arith.constant 0 : index
    %1 = vector.load %arg2[%c0_1, %c0_2] : memref<32x128xf32, #tpu.memory_space<vmem>>, vector<32x128xf32>
    %cst = arith.constant dense<0.000000e+00> : vector<8x128xf32>
    %2 = tpu.matmul %0, %1, %cst {dimension_numbers = #tpu.dot_dimension_numbers<[1], [0], [0], [1], [0, 0, 1, 1], [], []>} : vector<8x32xf32>, vector<32x128xf32>, vector<8x128xf32> -> vector<8x128xf32>
    %c0_3 = arith.constant 0 : index
    %c0_4 = arith.constant 0 : index
    %3 = vector.load %arg3[%c0_3, %c0_4] : memref<1x128xf32, #tpu.memory_space<vmem>>, vector<1x128xf32>
    %4 = vector.broadcast %3 : vector<1x128xf32> to vector<8x128xf32>
    %5 = arith.addf %2, %4 : vector<8x128xf32>
    %cst_5 = arith.constant 0.000000e+00 : f32
    %6 = vector.broadcast %cst_5 : f32 to vector<8x128xf32>
    %7 = arith.maximumf %5, %6 : vector<8x128xf32>
    %c0_6 = arith.constant 0 : index
    %c0_7 = arith.constant 0 : index
    %8 = vector.load %arg4[%c0_6, %c0_7] : memref<128x128xf32, #tpu.memory_space<vmem>>, vector<128x128xf32>
    %cst_8 = arith.constant dense<0.000000e+00> : vector<8x128xf32>
    %9 = tpu.matmul %7, %8, %cst_8 {dimension_numbers = #tpu.dot_dimension_numbers<[1], [0], [0], [1], [0, 0, 1, 1], [], []>} : vector<8x128xf32>, vector<128x128xf32>, vector<8x128xf32> -> vector<8x128xf32>
    %c0_9 = arith.constant 0 : index
    %c0_10 = arith.constant 0 : index
    %10 = vector.load %arg5[%c0_9, %c0_10] : memref<1x128xf32, #tpu.memory_space<vmem>>, vector<1x128xf32>
    %11 = vector.broadcast %10 : vector<1x128xf32> to vector<8x128xf32>
    %12 = arith.addf %9, %11 : vector<8x128xf32>
    %13 = vector.extract_strided_slice %12 {offsets = [0, 0], sizes = [8, 2], strides = [1, 1]} : vector<8x128xf32> to vector<8x2xf32>
    %c0_11 = arith.constant 0 : index
    %c0_12 = arith.constant 0 : index
    %14 = vector.load %arg6[%c0_11, %c0_12] : memref<8x2xf32, #tpu.memory_space<vmem>>, vector<8x2xf32>
    tpu.vector_store %arg6[%c0_11, %c0_12], %13 {strides = array<i32>} : memref<8x2xf32, #tpu.memory_space<vmem>>, vector<8x2xf32>,
    return
  }
  func.func @transform_0(%arg0: i32) -> (i32, i32) {
    %c0_i32 = arith.constant 0 : i32
    %c0_i32_0 = arith.constant 0 : i32
    return %arg0, %c0_i32 : i32, i32
  }
  func.func @transform_1(%arg0: i32) -> (i32, i32) {
    %c0_i32 = arith.constant 0 : i32
    %c0_i32_0 = arith.constant 0 : i32
    %c0_i32_1 = arith.constant 0 : i32
    return %c0_i32, %c0_i32_0 : i32, i32
  }
  func.func @transform_2(%arg0: i32) -> (i32, i32) {
    %c0_i32 = arith.constant 0 : i32
    %c0_i32_0 = arith.constant 0 : i32
    %c0_i32_1 = arith.constant 0 : i32
    return %c0_i32, %c0_i32_0 : i32, i32
  }
  func.func @transform_3(%arg0: i32) -> (i32, i32) {
    %c0_i32 = arith.constant 0 : i32
    %c0_i32_0 = arith.constant 0 : i32
    %c0_i32_1 = arith.constant 0 : i32
    return %c0_i32, %c0_i32_0 : i32, i32
  }
  func.func @transform_4(%arg0: i32) -> (i32, i32) {
    %c0_i32 = arith.constant 0 : i32
    %c0_i32_0 = arith.constant 0 : i32
    %c0_i32_1 = arith.constant 0 : i32
    return %c0_i32, %c0_i32_0 : i32, i32
  }
  func.func @transform_5(%arg0: i32) -> (i32, i32) {
    %c0_i32 = arith.constant 0 : i32
    %c0_i32_0 = arith.constant 0 : i32
    return %arg0, %c0_i32 : i32, i32
  }
}

</mosaic_0001>

<bundles_post_ra>
// kernel: tpu_custom_call.1
= control target key start
LH: loop header
LB: loop body
LE: loop exit
PB: predicated region body
PF: predicated region fallthrough
CT: control target
= control target key end

     0   :  { %10 = vsyncpa [#allocation3], 0  ;;  %s466_s0 = inlined_call_operand.hbm [shape: f32[8,32], index: 0, kind: input, shape index: {}]   ;;  %s467_s1 = inlined_call_operand.hbm [shape: f32[32,128], index: 1, kind: input, shape index: {}]   ;;  %s468_s2 = inlined_call_operand.vmem [shape: f32[1,128], index: 2, kind: input, shape index: {}]   ;;  %s469_s3 = inlined_call_operand.hbm [shape: f32[128,128], index: 3, kind: input, shape index: {}]   ;;  %s470_s4 = inlined_call_operand.vmem [shape: f32[1,128], index: 4, kind: input, shape index: {}]   ;;  %s471_s5 = inlined_call_operand.vmem [shape: f32[8,2], index: 5, kind: output, shape index: {}]  }
   0x1   :  { %11 = vsyncpa [#allocation5], 0  ;;  %s389_s18 = smov [#allocation4]  }
   0x2   :  { %s27_s19 = sshll.u32 %s389_s18, 4  ;;  %s28_s19 = int_to_ptr.vmem [resolvable:$true] %s27_s19 }
   0x3   :  { %s333_s20 = scalar_lea.vmem %s28_s19, 512  ;;  %p338_p1 = scmp.lt.s32.totalorder %s28_s19, %s28_s19 }
   0x4   :  { %p334_p0 = scmp.ne.s32.totalorder %s28_s19, %s333_s20  ;;  %p339_p2 = scmp.lt.s32.totalorder %s333_s20, %s333_s20 }
   0x6   :  { %p340_p3 = por %p339_p2, %p338_p1 }
   0x8   :  { %p341_p4 = pnand %p340_p3, %p334_p0 }
   0xa   :  { %344 = shalt.err (!%p341_p4)
}
   0xb   :  { %s390_s21 = smov 128   ;;  %s391_s22 = smov 8  }
   0xc   :  { %33 = dma.hbm_to_vmem [thread:$0]  %s467_s1, 512, %s28_s19, [#allocation5], %s390_s21, %s390_s21, %s391_s22  }
   0xd   :  { %s392_s25 = smov [#allocation2]   ;;  %s393_s27 = smov [#allocation6]  }
   0xe   :  { %s18_s26 = sshll.u32 %s392_s25, 4  ;;  %s41_s28 = sshll.u32 %s393_s27, 4  ;;  %s19_s26 = int_to_ptr.vmem [resolvable:$true] %s18_s26  ;;  %s42_s28 = int_to_ptr.vmem [resolvable:$true] %s41_s28 }
   0xf   :  { %s353_s29 = scalar_lea.vmem %s19_s26, 128  ;;  %p358_p6 = scmp.lt.s32.totalorder %s19_s26, %s19_s26 }
  0x10   :  { %p354_p5 = scmp.ne.s32.totalorder %s19_s26, %s353_s29  ;;  %p359_p7 = scmp.lt.s32.totalorder %s353_s29, %s353_s29 }
  0x12   :  { %p360_p8 = por %p359_p7, %p358_p6 }
  0x14   :  { %p361_p9 = pnand %p360_p8, %p354_p5 }
  0x16   :  { %364 = shalt.err (!%p361_p9)
}
  0x17   :  { %21 = dma.hbm_to_vmem [thread:$0]  %s466_s0, 128, %s19_s26, [#allocation3]  }
  0x18   :  { %s373_s7 = scalar_lea.vmem %s42_s28, 2048  ;;  %p378_p11 = scmp.lt.s32.totalorder %s42_s28, %s42_s28 }
  0x19   :  { %p374_p10 = scmp.ne.s32.totalorder %s42_s28, %s373_s7  ;;  %p379_p12 = scmp.lt.s32.totalorder %s373_s7, %s373_s7 }
  0x1b   :  { %p380_p13 = por %p379_p12, %p378_p11 }
  0x1d   :  { %p381_p0 = pnand %p380_p13, %p374_p10 }
  0x1f   :  { %384 = shalt.err (!%p381_p0)
}
  0x20   :  { %47 = dma.hbm_to_vmem [thread:$0]  %s469_s3, 2048, %s42_s28, [#allocation5], %s390_s21, %s390_s21, %s391_s22  }
  0x21   :  { %385 = dma.done.wait [#allocation3], 128  }
  0x22   :  { %386 = vsyncadd [#allocation3], 4294967168 }
  0x23   :  { %387 = dma.done.wait [#allocation5], 2560  }
  0x24   :  { %388 = vsyncadd [#allocation5], 4294964736  ;;  %v394_v0 = vmov 0.0   ;;  %vm395_vm0 = vmmov 0   ;;  %v63_v1 = vld [vmem:[#allocation4 + $0x18] sm:$0xff]  ;;  %v62_v2 = vld [vmem:[#allocation4 + $0x10] sm:$0xff] }
  0x25   :  { %272 = vmatprep.subr.mxu0 %v394_v0  ;;  %280 = vmatprep.mubr.msk.f32.mxu0 %vm395_vm0, %v394_v0  ;;  %v161_v3 = vld [vmem:[#allocation6 + $0x78] sm:$0xff]  ;;  %v61_v4 = vld [vmem:[#allocation4 + $0x8] sm:$0xff]  ;;  %v160_v5 = vld [vmem:[#allocation6 + $0x70] sm:$0xff]  ;;  %vm71_vm1 = vcmask 261120   ;;  %vm239_vm2 = vcmask 15360  }
  0x26   :  { %283 = vmatprep.subr.mxu1 %v394_v0  ;;  %315 = vmatprep.mubr.msk.f32.mxu1 %vm395_vm0, %v394_v0  ;;  %v159_v6 = vld [vmem:[#allocation6 + $0x68] sm:$0xff]  ;;  %v60_v7 = vld [vmem:[#allocation4] sm:$0xff]  ;;  %v59_v8 = vld [vmem:[#allocation2] sm:$0xff] }
  0x27   :  { %273 = vmatpush3.msra.mxu0 %v63_v1  ;;  %284 = vmatpush3.msra.mxu1 %v161_v3  ;;  %v158_v9 = vld [vmem:[#allocation6 + $0x60] sm:$0xff]  ;;  %v157_v10 = vld [vmem:[#allocation6 + $0x58] sm:$0xff]  ;;  %v156_v11 = vld [vmem:[#allocation6 + $0x50] sm:$0xff] }
  0x28   :  { %274 = vmatprep.subr.mxu0 %v394_v0  ;;  %285 = vmatprep.subr.mxu1 %v394_v0  ;;  %v155_v12 = vld [vmem:[#allocation6 + $0x48] sm:$0xff]  ;;  %v154_v13 = vld [vmem:[#allocation6 + $0x40] sm:$0xff]  ;;  %v153_v14 = vld [vmem:[#allocation6 + $0x38] sm:$0xff] }
  0x29   :  { %275 = vmatpush3.msra.mxu0 %v62_v2  ;;  %286 = vmatpush3.msra.mxu1 %v160_v5  ;;  %v152_v15 = vld [vmem:[#allocation6 + $0x30] sm:$0xff]  ;;  %v151_v16 = vld [vmem:[#allocation6 + $0x28] sm:$0xff]  ;;  %v150_v17 = vld [vmem:[#allocation6 + $0x20] sm:$0xff] }
  0x2a   :  { %276 = vmatprep.subr.mxu0 %v394_v0  ;;  %287 = vmatprep.subr.mxu1 %v394_v0  ;;  %v149_v18 = vld [vmem:[#allocation6 + $0x18] sm:$0xff]  ;;  %v148_v19 = vld [vmem:[#allocation6 + $0x10] sm:$0xff]  ;;  %v147_v20 = vld [vmem:[#allocation6 + $0x8] sm:$0xff] }
  0x2b   :  { %277 = vmatpush3.msra.mxu0 %v61_v4  ;;  %288 = vmatpush3.msra.mxu1 %v159_v6  ;;  %v146_v21 = vld [vmem:[#allocation6] sm:$0xff]  ;;  %v247_v22 = vld [vmem:[%s468_s2] ss:$0 sm:$0xff] }
  0x2c   :  { %278 = vmatprep.subr.mxu0 %v394_v0  ;;  %289 = vmatprep.subr.mxu1 %v394_v0  ;;  %v249_v27 = vld [vmem:[%s470_s4] ss:$0 sm:$0xff] }
  0x2d   :  { %279 = vmatpush3.msra.mxu0 %v60_v7  ;;  %290 = vmatpush3.msra.mxu1 %v158_v9 }
  0x2e   :  { %281 = vmatmul.mubr.msk.f32.vlgmr.msra.gmra.mxu0 %vm71_vm1, %v59_v8  ;;  %291 = vmatprep.subr.mxu1 %v394_v0 }
  0x2f   :  { %292 = vmatpush3.msra.mxu1 %v157_v10 }
  0x30   :  { %293 = vmatprep.subr.mxu1 %v394_v0 }
  0x31   :  { %294 = vmatpush3.msra.mxu1 %v156_v11 }
  0x32   :  { %295 = vmatprep.subr.mxu1 %v394_v0 }
  0x33   :  { %296 = vmatpush3.msra.mxu1 %v155_v12 }
  0x34   :  { %297 = vmatprep.subr.mxu1 %v394_v0 }
  0x35   :  { %298 = vmatpush3.msra.mxu1 %v154_v13 }
  0x36   :  { %299 = vmatprep.subr.mxu1 %v394_v0 }
  0x37   :  { %300 = vmatpush3.msra.mxu1 %v153_v14 }
  0x38   :  { %301 = vmatprep.subr.mxu1 %v394_v0 }
  0x39   :  { %302 = vmatpush3.msra.mxu1 %v152_v15 }
  0x3a   :  { %303 = vmatprep.subr.mxu1 %v394_v0 }
  0x3b   :  { %304 = vmatpush3.msra.mxu1 %v151_v16 }
  0x3c   :  { %305 = vmatprep.subr.mxu1 %v394_v0 }
  0x3d   :  { %306 = vmatpush3.msra.mxu1 %v150_v17 }
  0x3e   :  { %307 = vmatprep.subr.mxu1 %v394_v0 }
  0x3f   :  { %308 = vmatpush3.msra.mxu1 %v149_v18 }
  0x40   :  { %309 = vmatprep.subr.mxu1 %v394_v0 }
  0x41   :  { %310 = vmatpush3.msra.mxu1 %v148_v19 }
  0x42   :  { %311 = vmatprep.subr.mxu1 %v394_v0 }
  0x43   :  { %312 = vmatpush3.msra.mxu1 %v147_v20 }
  0x44   :  { %313 = vmatprep.subr.mxu1 %v394_v0 }
  0x45   :  { %314 = vmatpush3.msra.mxu1 %v146_v21 }
  0xee   :  { %v141_v23 = vpop.f32.mrf.mxu0 }
  0xef   :  { %v142_v24 = vadd.f32 %v247_v22, %v141_v23 }
  0xf0   :  { %v282_v25 = vpop.f32.mrf.mxu0 }
  0xf1   :  { %v145_v26 = vmax.f32 %v142_v24, 0.0 }
  0xf3   :  { %316 = vmatmul.mubr.f32.vlgmr.msra.gmra.mxu1 %v145_v26 }
 0x1b3   :  { %v235_v28 = vpop.f32.mrf.mxu1 }
 0x1b4   :  { %v236_v29 = vadd.f32 %v249_v27, %v235_v28 }
 0x1b5   :  { %v317_v30 = vpop.f32.mrf.mxu1 }
 0x1b6   :  { %240 = vst.msk [vmem:[%s471_s5] sm:$0xff] %vm239_vm2, %v236_v29 }
 0x1b7   :  { %245 = vsyncpa [#allocation3], 1 }
 0x1b8   :  { %246 = vsyncpa [#allocation5], 1 }

</bundles_post_ra>
